<compile_context>
chip_gen: v6e
topology: v6e:2x2x1
jax: 0.10.0
libtpu: 0.0.40
codegen_flags: <defaults>
</compile_context>

<pallas_src>
import functools
import math

import jax
import jax.numpy as jnp
from jax import lax
from jax.experimental import pallas as pl
from jax.experimental.pallas import tpu as pltpu


# ----------------------------------------------------------------------------
# Helpers
# ----------------------------------------------------------------------------

def _round_up(n, m):
    return ((n + m - 1) // m) * m


def _sublane(dtype):
    """Sublane multiple for the dtype: 8 (f32), 16 (bf16), 32 (int8/fp8)."""
    return max(8, 32 // jnp.dtype(dtype).itemsize)


def _tpu_caps():
    """(vmem_capacity_bytes, num_tensorcores) with safe fallbacks."""
    vmem_bytes = 128 * 1024 * 1024
    num_cores = 1
    try:
        info = pltpu.get_tpu_info()
        vmem_bytes = int(getattr(info, "vmem_capacity_bytes", vmem_bytes))
    except Exception:
        pass
    try:
        kind = jax.devices()[0].device_kind.lower()
        if "v7" in kind:
            num_cores = 2
    except Exception:
        pass
    if vmem_bytes <= 64 * 1024 * 1024:  # v7x-class TC -> assume 2 TCs/chip
        num_cores = max(num_cores, 2)
    return vmem_bytes, num_cores


@functools.lru_cache(maxsize=1)
def _buffered_weights_supported():
    """One-time feature probe: does this Pallas accept pipeline_mode=Buffered(1)?"""
    if not hasattr(pl, "Buffered"):
        return False

    def _probe(w_ref, o_ref):
        o_ref[...] = w_ref[...]

    try:
        spec = pl.BlockSpec((8, 128), lambda i: (0, 0),
                            pipeline_mode=pl.Buffered(1))
        out = pl.pallas_call(
            _probe,
            out_shape=jax.ShapeDtypeStruct((8, 128), jnp.float32),
            grid=(1,),
            in_specs=[spec],
            out_specs=pl.BlockSpec((8, 128), lambda i: (0, 0)),
        )(jnp.zeros((8, 128), jnp.float32))
        jax.block_until_ready(out)
        return True
    except Exception:
        return False


def _estimate_vmem_bytes(bt, lq_p, lk_p, din, dout_p, itemsize, weight_bufs):
    """Rough resident-set estimate: weights + pipelined I/O + intermediates."""
    f32 = 4
    din_l = max(_round_up(din, 128), 128)        # lane-padded storage
    weights = weight_bufs * itemsize * (din * dout_p          # Wq
                                        + din * 2 * dout_p    # Wk|Wv
                                        + dout_p * dout_p)    # Wo
    biases = weight_bufs * f32 * 4 * dout_p
    io = 2 * itemsize * bt * (lq_p * din_l + lk_p * din_l + lq_p * dout_p)
    inter = (bt * lq_p * dout_p * (f32 + itemsize)            # q acc + cast
             + bt * lk_p * 2 * dout_p * (f32 + itemsize)      # kv acc + cast
             + bt * lq_p * lk_p * (2 * f32 + itemsize)        # s, p, p(cast)
             + bt * lq_p * dout_p * (f32 + itemsize))         # zu + z
    return weights + biases + io + inter


def _pick_batch_tile(batch, lq_p, lk_p, din, dout_p, itemsize, vmem_cap,
                     num_cores, weight_bufs, target_rows=512):
    """Batch tile targeting ~512 flattened M rows, >=num_cores grid steps, and
    an estimated footprint under the per-generation VMEM cap."""
    bt = max(1, min(batch, max(1, target_rows // max(lq_p, 1))))
    if num_cores > 1 and batch >= num_cores:
        bt = min(bt, max(1, batch // num_cores))   # keep both TCs busy (v7x)
    while bt > 1 and _estimate_vmem_bytes(bt, lq_p, lk_p, din, dout_p,
                                          itemsize, weight_bufs) > vmem_cap:
        bt -= 1
    return bt


# ----------------------------------------------------------------------------
# Kernel
# ----------------------------------------------------------------------------

def cross_attention_kernel(x_ref, y_ref, wq_ref, bq_ref, wkv_ref, bkv_ref,
                           wo_ref, bo_ref, o_ref, *, lk_real, dout_p):
    bt, lq, din = x_ref.shape
    lk = y_ref.shape[1]
    in_dtype = x_ref.dtype

    # Flatten (batch-tile, seq): with seq dims sublane-aligned this is a pure
    # layout no-op, and each projection becomes one wide MXU matmul.
    x2 = x_ref[...].reshape(bt * lq, din)
    y2 = y_ref[...].reshape(bt * lk, din)

    # Projections: weights pre-transposed to (in, out); softmax scale already
    # folded into Wq/bq.  f32 accumulation, operands stay in the input dtype.
    q = (jnp.dot(x2, wq_ref[...], preferred_element_type=jnp.float32)
         + bq_ref[...]).astype(in_dtype)                      # (bt*lq, dout_p)
    kv = (jnp.dot(y2, wkv_ref[...], preferred_element_type=jnp.float32)
          + bkv_ref[...]).astype(in_dtype)                    # (bt*lk, 2*dout_p)

    q3 = q.reshape(bt, lq, dout_p)
    k3 = kv[:, :dout_p].reshape(bt, lk, dout_p)
    v3 = kv[:, dout_p:].reshape(bt, lk, dout_p)

    # Scores: contract feature dims directly (no k transpose materialized).
    s = lax.dot_general(
        q3, k3,
        dimension_numbers=(((2,), (2,)), ((0,), (0,))),
        preferred_element_type=jnp.float32)                   # (bt, lq, lk) f32

    if lk_real < lk:  # mask padded keys (zero-padded keys would be wrong)
        key_idx = lax.broadcasted_iota(jnp.int32, (1, 1, lk), 2)
        s = jnp.where(key_idx < lk_real, s, -jnp.inf)

    # Numerically-stable softmax; stats in f32. Exact reciprocal for f32
    # inputs, approx (EUP, ~free) otherwise.
    m = jnp.max(s, axis=-1, keepdims=True)
    p = jnp.exp(s - m)
    denom = jnp.sum(p, axis=-1, keepdims=True)
    inv = pl.reciprocal(denom, approx=(in_dtype != jnp.float32))

    # Attention-weighted values; normalize afterwards (Lq*Dout scalars).
    zu = lax.dot_general(
        p.astype(in_dtype), v3,
        dimension_numbers=(((2,), (1,)), ((0,), (0,))),
        preferred_element_type=jnp.float32)                   # (bt, lq, dout_p)
    z = (zu * inv).astype(in_dtype).reshape(bt * lq, dout_p)

    # Output projection.
    out = (jnp.dot(z, wo_ref[...], preferred_element_type=jnp.float32)
           + bo_ref[...])
    o_ref[...] = out.reshape(bt, lq, dout_p).astype(o_ref.dtype)


# ----------------------------------------------------------------------------
# Wrapper
# ----------------------------------------------------------------------------

def _pack_params(params, w_dtype, scale):
    """One-time packing: transpose to (in, out), pad Dout to 128, fuse Wk|Wv,
    fold the softmax scale into Wq/bq.  Biases stay f32."""
    dout, din = params["wq"].shape
    dout_p = _round_up(dout, 128)

    def prep_w(w, in_rows, s=1.0):
        wt = (jnp.asarray(w, jnp.float32) * s).T
        wt = jnp.pad(wt, ((0, in_rows - wt.shape[0]), (0, dout_p - wt.shape[1])))
        return wt.astype(w_dtype)

    def prep_b(b, s=1.0):
        bb = jnp.asarray(b, jnp.float32) * s
        return jnp.pad(bb, (0, dout_p - bb.shape[0])).reshape(1, dout_p)

    packed = dict(
        wq=prep_w(params["wq"], din, scale),
        bq=prep_b(params["bq"], scale),
        wkv=jnp.concatenate([prep_w(params["wk"], din),
                             prep_w(params["wv"], din)], axis=1),
        bkv=jnp.concatenate([prep_b(params["bk"]), prep_b(params["bv"])], axis=1),
        wo=prep_w(params["wo"], dout_p),
        bo=prep_b(params["bo"]),
    )
    return packed, dout_p


def _cross_attention_impl(x, y, packed, *, dout, dout_p, vmem_cap, num_cores,
                          single_buffer, compute_dtype):
    B, Lq, Din = x.shape
    _, Lk, _ = y.shape
    out_dtype = x.dtype
    in_dtype = jnp.dtype(compute_dtype) if compute_dtype is not None else x.dtype
    itemsize = jnp.dtype(in_dtype).itemsize
    sub = _sublane(in_dtype)

    if x.dtype != in_dtype:
        x = x.astype(in_dtype)
        y = y.astype(in_dtype)

    # Sublane-align seq dims only when needed (layout-free reshapes in-kernel).
    Lq_p = _round_up(Lq, sub)
    Lk_p = _round_up(Lk, sub)
    if Lq_p != Lq:
        x = jnp.pad(x, ((0, 0), (0, Lq_p - Lq), (0, 0)))
    if Lk_p != Lk:
        y = jnp.pad(y, ((0, 0), (0, Lk_p - Lk), (0, 0)))

    weight_bufs = 1 if single_buffer else 2
    Bt = _pick_batch_tile(B, Lq_p, Lk_p, Din, dout_p, itemsize,
                          vmem_cap, num_cores, weight_bufs)
    grid_b = pl.cdiv(B, Bt)
    B_p = grid_b * Bt
    if B_p != B:  # non-divisor batch: pad instead of collapsing Bt to 1
        x = jnp.pad(x, ((0, B_p - B), (0, 0), (0, 0)))
        y = jnp.pad(y, ((0, B_p - B), (0, 0), (0, 0)))

    kernel = functools.partial(cross_attention_kernel,
                               lk_real=Lk, dout_p=dout_p)

    def const_spec(shape):
        idx = lambda b: (0,) * len(shape)
        if single_buffer:
            # Grid-invariant weights/biases: single buffer -> half the VMEM.
            return pl.BlockSpec(shape, idx, pipeline_mode=pl.Buffered(1))
        return pl.BlockSpec(shape, idx)

    wq, bq = packed["wq"], packed["bq"]
    wkv, bkv = packed["wkv"], packed["bkv"]
    wo, bo = packed["wo"], packed["bo"]

    grid_spec = pltpu.PrefetchScalarGridSpec(
        num_scalar_prefetch=0,
        grid=(grid_b,),
        in_specs=[
            pl.BlockSpec((Bt, Lq_p, Din), lambda b: (b, 0, 0)),   # x (Din unpadded)
            pl.BlockSpec((Bt, Lk_p, Din), lambda b: (b, 0, 0)),   # y
            const_spec((Din, dout_p)),          # Wq^T (scale folded)
            const_spec((1, dout_p)),            # bq (scaled, f32)
            const_spec((Din, 2 * dout_p)),      # [Wk^T | Wv^T]
            const_spec((1, 2 * dout_p)),        # [bk | bv] (f32)
            const_spec((dout_p, dout_p)),       # Wo^T
            const_spec((1, dout_p)),            # bo (f32)
        ],
        out_specs=pl.BlockSpec((Bt, Lq_p, dout_p), lambda b: (b, 0, 0)),
    )

    flops = 2 * B_p * (Lq_p * Din * dout_p            # q projection
                       + Lk_p * Din * 2 * dout_p      # fused k/v projection
                       + 2 * Lq_p * Lk_p * dout_p     # scores + attn @ v
                       + Lq_p * dout_p * dout_p)      # output projection
    bytes_w = sum(int(v.size) * v.dtype.itemsize
                  for v in (wq, bq, wkv, bkv, wo, bo))
    bytes_accessed = (int(x.size) + int(y.size)) * itemsize \
        + B_p * Lq_p * dout_p * itemsize + bytes_w
    cost = pl.CostEstimate(flops=int(flops),
                           transcendentals=int(B_p * Lq_p * Lk_p),
                           bytes_accessed=int(bytes_accessed))

    out_p = pl.pallas_call(
        kernel,
        out_shape=jax.ShapeDtypeStruct((B_p, Lq_p, dout_p), in_dtype),
        grid_spec=grid_spec,
        compiler_params=pltpu.CompilerParams(
            dimension_semantics=("parallel",),
            vmem_limit_bytes=int(vmem_cap),
        ),
        cost_estimate=cost,
    )(x, y, wq, bq, wkv, bkv, wo, bo)

    out = out_p[:B, :Lq, :dout]
    return out.astype(out_dtype)


def make_cross_attention(params, compute_dtype=None):
    """Pre-pack weights once and return a jitted (x, y) -> out callable.

    Set compute_dtype=jnp.bfloat16 to run the MXU matmuls in bf16 (faster on
    all generations; changes numerics vs. the f32 reference)."""
    dout, _din = params["wq"].shape
    scale = 1.0 / math.sqrt(dout)  # PyTorch SDPA: 1/sqrt(E_q) of the REAL dim
    w_dtype = (jnp.dtype(compute_dtype) if compute_dtype is not None
               else jnp.asarray(params["wq"]).dtype)
    packed, dout_p = _pack_params(params, w_dtype, scale)

    vmem_capacity, num_cores = _tpu_caps()
    vmem_cap = min(int(0.75 * vmem_capacity), 100 * 1024 * 1024)
    single_buffer = _buffered_weights_supported()

    impl = jax.jit(functools.partial(
        _cross_attention_impl,
        dout=dout, dout_p=dout_p, vmem_cap=vmem_cap, num_cores=num_cores,
        single_buffer=single_buffer, compute_dtype=compute_dtype))

    def fwd(x, y):
        return impl(x, y, packed)

    return fwd


def cross_attention(x, y, params):
    """Convenience one-shot entry point (packs weights on every call)."""
    return make_cross_attention(params)(x, y)


# ----------------------------------------------------------------------------
# Pure-JAX reference + init
# ----------------------------------------------------------------------------

def reference_cross_attention(x, y, params):
    """Pure-JAX reference mirroring the PyTorch module."""
    def linear(a, w, b):
        return a @ w.T + b

    q = linear(x, params["wq"], params["bq"])
    k = linear(y, params["wk"], params["bk"])
    v = linear(y, params["wv"], params["bv"])
    scale = 1.0 / math.sqrt(q.shape[-1])
    s = jnp.einsum("bqd,bkd->bqk", q, k) * scale
    a = jax.nn.softmax(s, axis=-1)
    z = jnp.einsum("bqk,bkd->bqd", a, v)
    return linear(z, params["wo"], params["bo"])


def init_params(key, input_dim, output_dim, dtype=jnp.float32):
    ks = jax.random.split(key, 8)

    def lin_init(kw, kb, out_d, in_d):
        bound = 1.0 / math.sqrt(in_d)
        w = jax.random.uniform(kw, (out_d, in_d), dtype, -bound, bound)
        b = jax.random.uniform(kb, (out_d,), dtype, -bound, bound)
        return w, b

    wq, bq = lin_init(ks[0], ks[1], output_dim, input_dim)
    wk, bk = lin_init(ks[2], ks[3], output_dim, input_dim)
    wv, bv = lin_init(ks[4], ks[5], output_dim, input_dim)
    wo, bo = lin_init(ks[6], ks[7], output_dim, output_dim)
    return dict(wq=wq, bq=bq, wk=wk, bk=bk, wv=wv, bv=bv, wo=wo, bo=bo)


if __name__ == "__main__":
    key = jax.random.PRNGKey(0)
    k_x, k_y, k_p = jax.random.split(key, 3)

    B, Lq, Lk = 2, 8, 8
    input_dim, output_dim = 32, 32

    x = jax.random.normal(k_x, (B, Lq, input_dim), jnp.float32)
    y = jax.random.normal(k_y, (B, Lk, input_dim), jnp.float32)
    params = init_params(k_p, input_dim, output_dim)

    attn = make_cross_attention(params)          # weights packed once here
    out = jax.block_until_ready(attn(x, y))
    ref = jax.block_until_ready(reference_cross_attention(x, y, params))

    assert out.shape == (B, Lq, output_dim)
    assert jnp.allclose(out, ref, atol=1e-3, rtol=1e-3), (
        f"max abs err {jnp.max(jnp.abs(out - ref))}"
    )

    print("KERNEL_OK")
</pallas_src>

<mosaic_0001>
module attributes {stable_mosaic.version = 11 : i64} {
  func.func @_probe(%arg0: i32, %arg1: memref<8x128xf32, #tpu.memory_space<vmem>>, %arg2: memref<8x128xf32, #tpu.memory_space<vmem>>) attributes {dimension_semantics = [#tpu.dimension_semantics<arbitrary>], iteration_bounds = array<i64: 1>, scalar_prefetch = 0 : i64, scratch_operands = 0 : i64, tpu.core_type = #tpu.core_type<tc>, window_params = [{pipeline_mode = #tpu.pipeline_mode<synchronous>, transform_indices = @transform_0, window_bounds = array<i64: 8, 128>}, {pipeline_mode = #tpu.pipeline_mode<synchronous>, transform_indices = @transform_1, window_bounds = array<i64: 8, 128>}]} {
    %c0 = arith.constant 0 : index
    %c0_0 = arith.constant 0 : index
    %0 = vector.load %arg1[%c0, %c0_0] : memref<8x128xf32, #tpu.memory_space<vmem>>, vector<8x128xf32>
    %c0_1 = arith.constant 0 : index
    %c0_2 = arith.constant 0 : index
    %1 = vector.load %arg2[%c0_1, %c0_2] : memref<8x128xf32, #tpu.memory_space<vmem>>, vector<8x128xf32>
    tpu.vector_store %arg2[%c0_1, %c0_2], %0 {strides = array<i32>} : memref<8x128xf32, #tpu.memory_space<vmem>>, vector<8x128xf32>,
    return
  }
  func.func @transform_0(%arg0: i32) -> (i32, i32) {
    %c0_i32 = arith.constant 0 : i32
    %c0_i32_0 = arith.constant 0 : i32
    %c0_i32_1 = arith.constant 0 : i32
    return %c0_i32, %c0_i32_0 : i32, i32
  }
  func.func @transform_1(%arg0: i32) -> (i32, i32) {
    %c0_i32 = arith.constant 0 : i32
    %c0_i32_0 = arith.constant 0 : i32
    %c0_i32_1 = arith.constant 0 : i32
    return %c0_i32, %c0_i32_0 : i32, i32
  }
}

module attributes {stable_mosaic.version = 11 : i64} {
  func.func @cross_attention_kernel(%arg0: i32, %arg1: memref<2x8x32xf32, #tpu.memory_space<vmem>>, %arg2: memref<2x8x32xf32, #tpu.memory_space<vmem>>, %arg3: memref<32x128xf32, #tpu.memory_space<vmem>>, %arg4: memref<1x128xf32, #tpu.memory_space<vmem>>, %arg5: memref<32x256xf32, #tpu.memory_space<vmem>>, %arg6: memref<1x256xf32, #tpu.memory_space<vmem>>, %arg7: memref<128x128xf32, #tpu.memory_space<vmem>>, %arg8: memref<1x128xf32, #tpu.memory_space<vmem>>, %arg9: memref<2x8x128xf32, #tpu.memory_space<vmem>>) attributes {dimension_semantics = [#tpu.dimension_semantics<parallel>], iteration_bounds = array<i64: 1>, scalar_prefetch = 0 : i64, scratch_operands = 0 : i64, tpu.core_type = #tpu.core_type<tc>, window_params = [{transform_indices = @transform_0, window_bounds = array<i64: 2, 8, 32>}, {transform_indices = @transform_1, window_bounds = array<i64: 2, 8, 32>}, {pipeline_mode = #tpu.pipeline_mode<synchronous>, transform_indices = @transform_2, window_bounds = array<i64: 32, 128>}, {pipeline_mode = #tpu.pipeline_mode<synchronous>, transform_indices = @transform_3, window_bounds = array<i64: 1, 128>}, {pipeline_mode = #tpu.pipeline_mode<synchronous>, transform_indices = @transform_4, window_bounds = array<i64: 32, 256>}, {pipeline_mode = #tpu.pipeline_mode<synchronous>, transform_indices = @transform_5, window_bounds = array<i64: 1, 256>}, {pipeline_mode = #tpu.pipeline_mode<synchronous>, transform_indices = @transform_6, window_bounds = array<i64: 128, 128>}, {pipeline_mode = #tpu.pipeline_mode<synchronous>, transform_indices = @transform_7, window_bounds = array<i64: 1, 128>}, {transform_indices = @transform_8, window_bounds = array<i64: 2, 8, 128>}]} {
    %c0 = arith.constant 0 : index
    %c0_0 = arith.constant 0 : index
    %c0_1 = arith.constant 0 : index
    %0 = vector.load %arg1[%c0, %c0_0, %c0_1] : memref<2x8x32xf32, #tpu.memory_space<vmem>>, vector<2x8x32xf32>
    %1 = vector.shape_cast %0 : vector<2x8x32xf32> to vector<16x32xf32>
    %c0_2 = arith.constant 0 : index
    %c0_3 = arith.constant 0 : index
    %c0_4 = arith.constant 0 : index
    %2 = vector.load %arg2[%c0_2, %c0_3, %c0_4] : memref<2x8x32xf32, #tpu.memory_space<vmem>>, vector<2x8x32xf32>
    %3 = vector.shape_cast %2 : vector<2x8x32xf32> to vector<16x32xf32>
    %c0_5 = arith.constant 0 : index
    %c0_6 = arith.constant 0 : index
    %4 = vector.load %arg3[%c0_5, %c0_6] : memref<32x128xf32, #tpu.memory_space<vmem>>, vector<32x128xf32>
    %cst = arith.constant dense<0.000000e+00> : vector<16x128xf32>
    %5 = tpu.matmul %1, %4, %cst {dimension_numbers = #tpu.dot_dimension_numbers<[1], [0], [0], [1], [0, 0, 1, 1], [], []>} : vector<16x32xf32>, vector<32x128xf32>, vector<16x128xf32> -> vector<16x128xf32>
    %c0_7 = arith.constant 0 : index
    %c0_8 = arith.constant 0 : index
    %6 = vector.load %arg4[%c0_7, %c0_8] : memref<1x128xf32, #tpu.memory_space<vmem>>, vector<1x128xf32>
    %7 = vector.broadcast %6 : vector<1x128xf32> to vector<16x128xf32>
    %8 = arith.addf %5, %7 : vector<16x128xf32>
    %c0_9 = arith.constant 0 : index
    %c0_10 = arith.constant 0 : index
    %9 = vector.load %arg5[%c0_9, %c0_10] : memref<32x256xf32, #tpu.memory_space<vmem>>, vector<32x256xf32>
    %cst_11 = arith.constant dense<0.000000e+00> : vector<16x256xf32>
    %10 = tpu.matmul %3, %9, %cst_11 {dimension_numbers = #tpu.dot_dimension_numbers<[1], [0], [0], [1], [0, 0, 1, 1], [], []>} : vector<16x32xf32>, vector<32x256xf32>, vector<16x256xf32> -> vector<16x256xf32>
    %c0_12 = arith.constant 0 : index
    %c0_13 = arith.constant 0 : index
    %11 = vector.load %arg6[%c0_12, %c0_13] : memref<1x256xf32, #tpu.memory_space<vmem>>, vector<1x256xf32>
    %12 = vector.broadcast %11 : vector<1x256xf32> to vector<16x256xf32>
    %13 = arith.addf %10, %12 : vector<16x256xf32>
    %14 = vector.shape_cast %8 : vector<16x128xf32> to vector<2x8x128xf32>
    %15 = vector.extract_strided_slice %13 {offsets = [0, 0], sizes = [16, 128], strides = [1, 1]} : vector<16x256xf32> to vector<16x128xf32>
    %16 = vector.shape_cast %15 : vector<16x128xf32> to vector<2x8x128xf32>
    %17 = vector.extract_strided_slice %13 {offsets = [0, 128], sizes = [16, 128], strides = [1, 1]} : vector<16x256xf32> to vector<16x128xf32>
    %18 = vector.shape_cast %17 : vector<16x128xf32> to vector<2x8x128xf32>
    %cst_14 = arith.constant dense<0.000000e+00> : vector<2x8x8xf32>
    %19 = tpu.matmul %14, %16, %cst_14 {dimension_numbers = #tpu.dot_dimension_numbers<[2], [2], [1], [1], [0, 0, 0, 1, 1, 1], [0], [0]>} : vector<2x8x128xf32>, vector<2x8x128xf32>, vector<2x8x8xf32> -> vector<2x8x8xf32>
    %cst_15 = arith.constant dense<0xFF800000> : vector<2x8xf32>
    %20 = vector.multi_reduction <maximumf>, %19, %cst_15 [2] : vector<2x8x8xf32> to vector<2x8xf32>
    %21 = vector.shape_cast %20 : vector<2x8xf32> to vector<2x8x1xf32>
    %22 = vector.broadcast %21 : vector<2x8x1xf32> to vector<2x8x8xf32>
    %23 = arith.subf %19, %22 : vector<2x8x8xf32>
    %24 = math.exp %23 : vector<2x8x8xf32>
    %cst_16 = arith.constant dense<0.000000e+00> : vector<2x8xf32>
    %25 = vector.multi_reduction <add>, %24, %cst_16 [2] : vector<2x8x8xf32> to vector<2x8xf32>
    %26 = vector.shape_cast %25 : vector<2x8xf32> to vector<2x8x1xf32>
    %27 = tpu.reciprocal %26 : vector<2x8x1xf32> -> vector<2x8x1xf32>
    %cst_17 = arith.constant dense<0.000000e+00> : vector<2x8x128xf32>
    %28 = tpu.matmul %24, %18, %cst_17 {dimension_numbers = #tpu.dot_dimension_numbers<[2], [1], [1], [2], [0, 0, 0, 1, 1, 2], [0], [0]>} : vector<2x8x8xf32>, vector<2x8x128xf32>, vector<2x8x128xf32> -> vector<2x8x128xf32>
    %29 = vector.broadcast %27 : vector<2x8x1xf32> to vector<2x8x128xf32>
    %30 = arith.mulf %28, %29 : vector<2x8x128xf32>
    %31 = vector.shape_cast %30 : vector<2x8x128xf32> to vector<16x128xf32>
    %c0_18 = arith.constant 0 : index
    %c0_19 = arith.constant 0 : index
    %32 = vector.load %arg7[%c0_18, %c0_19] : memref<128x128xf32, #tpu.memory_space<vmem>>, vector<128x128xf32>
    %cst_20 = arith.constant dense<0.000000e+00> : vector<16x128xf32>
    %33 = tpu.matmul %31, %32, %cst_20 {dimension_numbers = #tpu.dot_dimension_numbers<[1], [0], [0], [1], [0, 0, 1, 1], [], []>} : vector<16x128xf32>, vector<128x128xf32>, vector<16x128xf32> -> vector<16x128xf32>
    %c0_21 = arith.constant 0 : index
    %c0_22 = arith.constant 0 : index
    %34 = vector.load %arg8[%c0_21, %c0_22] : memref<1x128xf32, #tpu.memory_space<vmem>>, vector<1x128xf32>
    %35 = vector.broadcast %34 : vector<1x128xf32> to vector<16x128xf32>
    %36 = arith.addf %33, %35 : vector<16x128xf32>
    %37 = vector.shape_cast %36 : vector<16x128xf32> to vector<2x8x128xf32>
    %c0_23 = arith.constant 0 : index
    %c0_24 = arith.constant 0 : index
    %c0_25 = arith.constant 0 : index
    %38 = vector.load %arg9[%c0_23, %c0_24, %c0_25] : memref<2x8x128xf32, #tpu.memory_space<vmem>>, vector<2x8x128xf32>
    tpu.vector_store %arg9[%c0_23, %c0_24, %c0_25], %37 {strides = array<i32>} : memref<2x8x128xf32, #tpu.memory_space<vmem>>, vector<2x8x128xf32>,
    return
  }
  func.func @transform_0(%arg0: i32) -> (i32, i32, i32) {
    %c0_i32 = arith.constant 0 : i32
    %c0_i32_0 = arith.constant 0 : i32
    %c0_i32_1 = arith.constant 0 : i32
    return %arg0, %c0_i32, %c0_i32_0 : i32, i32, i32
  }
  func.func @transform_1(%arg0: i32) -> (i32, i32, i32) {
    %c0_i32 = arith.constant 0 : i32
    %c0_i32_0 = arith.constant 0 : i32
    %c0_i32_1 = arith.constant 0 : i32
    return %arg0, %c0_i32, %c0_i32_0 : i32, i32, i32
  }
  func.func @transform_2(%arg0: i32) -> (i32, i32) {
    %c0_i32 = arith.constant 0 : i32
    %c0_i32_0 = arith.constant 0 : i32
    %c0_i32_1 = arith.constant 0 : i32
    return %c0_i32, %c0_i32_0 : i32, i32
  }
  func.func @transform_3(%arg0: i32) -> (i32, i32) {
    %c0_i32 = arith.constant 0 : i32
    %c0_i32_0 = arith.constant 0 : i32
    %c0_i32_1 = arith.constant 0 : i32
    return %c0_i32, %c0_i32_0 : i32, i32
  }
  func.func @transform_4(%arg0: i32) -> (i32, i32) {
    %c0_i32 = arith.constant 0 : i32
    %c0_i32_0 = arith.constant 0 : i32
    %c0_i32_1 = arith.constant 0 : i32
    return %c0_i32, %c0_i32_0 : i32, i32
  }
  func.func @transform_5(%arg0: i32) -> (i32, i32) {
    %c0_i32 = arith.constant 0 : i32
    %c0_i32_0 = arith.constant 0 : i32
    %c0_i32_1 = arith.constant 0 : i32
    return %c0_i32, %c0_i32_0 : i32, i32
  }
  func.func @transform_6(%arg0: i32) -> (i32, i32) {
    %c0_i32 = arith.constant 0 : i32
    %c0_i32_0 = arith.constant 0 : i32
    %c0_i32_1 = arith.constant 0 : i32
    return %c0_i32, %c0_i32_0 : i32, i32
  }
  func.func @transform_7(%arg0: i32) -> (i32, i32) {
    %c0_i32 = arith.constant 0 : i32
    %c0_i32_0 = arith.constant 0 : i32
    %c0_i32_1 = arith.constant 0 : i32
    return %c0_i32, %c0_i32_0 : i32, i32
  }
  func.func @transform_8(%arg0: i32) -> (i32, i32, i32) {
    %c0_i32 = arith.constant 0 : i32
    %c0_i32_0 = arith.constant 0 : i32
    %c0_i32_1 = arith.constant 0 : i32
    return %arg0, %c0_i32, %c0_i32_0 : i32, i32, i32
  }
}

</mosaic_0001>

<bundles_post_ra>
// kernel: tpu_custom_call.1
= control target key start
LH: loop header
LB: loop body
LE: loop exit
PB: predicated region body
PF: predicated region fallthrough
CT: control target
= control target key end

     0   :  { %6 = vsyncpa [#allocation3], 0  ;;  %s102_s0 = inlined_call_operand.hbm [shape: f32[8,128], index: 0, kind: input, shape index: {}]   ;;  %s103_s1 = inlined_call_operand.hbm [shape: f32[8,128], index: 1, kind: output, shape index: {}]  }
   0x1   :  { %7 = vsyncpa [#allocation4], 0  ;;  %s84_s6 = smov [#allocation2]  }
   0x2   :  { %s14_s7 = sshll.u32 %s84_s6, 4  ;;  %s15_s7 = int_to_ptr.vmem [resolvable:$true] %s14_s7 }
   0x3   :  { %s48_s8 = scalar_lea.vmem %s15_s7, 128  ;;  %p53_p1 = scmp.lt.s32.totalorder %s15_s7, %s15_s7 }
   0x4   :  { %p49_p0 = scmp.ne.s32.totalorder %s15_s7, %s48_s8  ;;  %p54_p2 = scmp.lt.s32.totalorder %s48_s8, %s48_s8 }
   0x6   :  { %p55_p3 = por %p54_p2, %p53_p1 }
   0x8   :  { %p56_p4 = pnand %p55_p3, %p49_p0 }
   0xa   :  { %59 = shalt.err (!%p56_p4)
}
   0xb   :  { %17 = dma.hbm_to_vmem [thread:$0]  %s102_s0, 128, %s15_s7, [#allocation3]  }
   0xc   :  { %80 = dma.done.wait [#allocation3], 128  }
   0xd   :  { %81 = vsyncadd [#allocation3], 4294967168  ;;  %s85_s11 = smov [#allocation5]   ;;  %v21_v0 = vld [vmem:[#allocation2] sm:$0xff] }
   0xe   :  { %s29_s12 = sshll.u32 %s85_s11, 4  ;;  %22 = vst [vmem:[#allocation5] sm:$0xff] %v21_v0  ;;  %s30_s12 = int_to_ptr.vmem [resolvable:$true] %s29_s12 }
   0xf   :  { %s60_s13 = scalar_lea.vmem %s30_s12, 128  ;;  %p65_p6 = scmp.lt.s32.totalorder %s30_s12, %s30_s12 }
  0x10   :  { %p61_p5 = scmp.ne.s32.totalorder %s30_s12, %s60_s13  ;;  %p66_p7 = scmp.lt.s32.totalorder %s60_s13, %s60_s13 }
  0x12   :  { %p67_p8 = por %p66_p7, %p65_p6 }
  0x14   :  { %p68_p9 = pnand %p67_p8, %p61_p5 }
  0x16   :  { %71 = shalt.err (!%p68_p9)
}
  0x17   :  { %32 = dma.vmem_to_hbm [thread:$0]  %s30_s12, 128, %s103_s1, [#allocation4]  }
  0x18   :  { %82 = dma.done.wait [#allocation4], 128  }
  0x19   :  { %83 = vsyncadd [#allocation4], 4294967168 }
  0x1a   :  { %36 = vsyncpa [#allocation3], 1 }
  0x1b   :  { %37 = vsyncpa [#allocation4], 1 }

// kernel: _cross_attention_impl.1
= control target key start
LH: loop header
LB: loop body
LE: loop exit
PB: predicated region body
PF: predicated region fallthrough
CT: control target
= control target key end

     0   :  { %13 = vsyncpa [#allocation3], 0  ;;  %s1103_s0 = inlined_call_operand.hbm [shape: f32[2,8,32], index: 0, kind: input, shape index: {}]   ;;  %s1104_s1 = inlined_call_operand.hbm [shape: f32[2,8,32], index: 1, kind: input, shape index: {}]   ;;  %s1105_s2 = inlined_call_operand.hbm [shape: f32[32,128], index: 2, kind: input, shape index: {}]   ;;  %s1106_s3 = inlined_call_operand.vmem [shape: f32[1,128], index: 3, kind: input, shape index: {}]   ;;  %s1107_s4 = inlined_call_operand.hbm [shape: f32[32,256], index: 4, kind: input, shape index: {}]   ;;  %s1108_s5 = inlined_call_operand.vmem [shape: f32[1,256], index: 5, kind: input, shape index: {}]   ;;  %s1109_s6 = inlined_call_operand.hbm [shape: f32[128,128], index: 6, kind: input, shape index: {}]   ;;  %s1110_s7 = inlined_call_operand.vmem [shape: f32[1,128], index: 7, kind: input, shape index: {}]   ;;  %s1111_s8 = inlined_call_operand.hbm [shape: f32[2,8,128], index: 8, kind: output, shape index: {}]  }
   0x1   :  { %14 = vsyncpa [#allocation6], 0 }
   0x2   :  { %15 = vsyncpa [#allocation9], 0 }
   0x3   :  { %16 = vsyncpa [#allocation4], 0  ;;  %s980_s27 = smov [#allocation5]   ;;  %s981_s29 = smov [#allocation8]  }
   0x4   :  { %s34_s28 = sshll.u32 %s980_s27, 4  ;;  %s60_s30 = sshll.u32 %s981_s29, 4  ;;  %s35_s28 = int_to_ptr.vmem [resolvable:$true] %s34_s28  ;;  %s61_s30 = int_to_ptr.vmem [resolvable:$true] %s60_s30 }
   0x5   :  { %s860_s9 = scalar_lea.vmem %s35_s28, 256  ;;  %p865_p1 = scmp.lt.s32.totalorder %s35_s28, %s35_s28 }
   0x6   :  { %p861_p0 = scmp.ne.s32.totalorder %s35_s28, %s860_s9  ;;  %p866_p2 = scmp.lt.s32.totalorder %s860_s9, %s860_s9 }
   0x8   :  { %p867_p3 = por %p866_p2, %p865_p1 }
   0xa   :  { %p868_p4 = pnand %p867_p3, %p861_p0 }
   0xc   :  { %871 = shalt.err (!%p868_p4)
}
   0xd   :  { %s982_s10 = smov 128   ;;  %s983_s11 = smov 8  }
   0xe   :  { %40 = dma.hbm_to_vmem [thread:$0]  %s1104_s1, 256, %s35_s28, [#allocation6], %s982_s10, %s982_s10, %s983_s11  }
   0xf   :  { %s880_s14 = scalar_lea.vmem %s61_s30, 1024  ;;  %p885_p6 = scmp.lt.s32.totalorder %s61_s30, %s61_s30 }
  0x10   :  { %p881_p5 = scmp.ne.s32.totalorder %s61_s30, %s880_s14  ;;  %p886_p7 = scmp.lt.s32.totalorder %s880_s14, %s880_s14 }
  0x12   :  { %p887_p8 = por %p886_p7, %p885_p6 }
  0x14   :  { %p888_p9 = pnand %p887_p8, %p881_p5 }
  0x16   :  { %891 = shalt.err (!%p888_p9)
}
  0x17   :  { %s984_s15 = smov 256   ;;  %s985_s16 = smov 16  }
  0x18   :  { %66 = dma.hbm_to_vmem [thread:$0]  %s1107_s4, 1024, %s61_s30, [#allocation9], %s984_s15, %s984_s15, %s985_s16  }
  0x19   :  { %s986_s19 = smov [#allocation2]   ;;  %s987_s21 = smov [#allocation7]  }
  0x1a   :  { %s22_s20 = sshll.u32 %s986_s19, 4  ;;  %s46_s22 = sshll.u32 %s987_s21, 4  ;;  %s23_s20 = int_to_ptr.vmem [resolvable:$true] %s22_s20  ;;  %s47_s22 = int_to_ptr.vmem [resolvable:$true] %s46_s22 }
  0x1b   :  { %s900_s1 = scalar_lea.vmem %s23_s20, 256  ;;  %p905_p11 = scmp.lt.s32.totalorder %s23_s20, %s23_s20 }
  0x1c   :  { %p901_p10 = scmp.ne.s32.totalorder %s23_s20, %s900_s1  ;;  %p906_p12 = scmp.lt.s32.totalorder %s900_s1, %s900_s1 }
  0x1e   :  { %p907_p13 = por %p906_p12, %p905_p11 }
  0x20   :  { %p908_p0 = pnand %p907_p13, %p901_p10 }
  0x22   :  { %911 = shalt.err (!%p908_p0)
}
  0x23   :  { %28 = dma.hbm_to_vmem [thread:$0]  %s1103_s0, 256, %s23_s20, [#allocation3], %s982_s10, %s982_s10, %s983_s11  }
  0x24   :  { %s920_s4 = scalar_lea.vmem %s47_s22, 512  ;;  %p925_p2 = scmp.lt.s32.totalorder %s47_s22, %s47_s22 }
  0x25   :  { %p921_p1 = scmp.ne.s32.totalorder %s47_s22, %s920_s4  ;;  %p926_p3 = scmp.lt.s32.totalorder %s920_s4, %s920_s4 }
  0x27   :  { %p927_p4 = por %p926_p3, %p925_p2 }
  0x29   :  { %p928_p5 = pnand %p927_p4, %p921_p1 }
  0x2b   :  { %931 = shalt.err (!%p928_p5)
}
  0x2c   :  { %52 = dma.hbm_to_vmem [thread:$0]  %s1105_s2, 512, %s47_s22, [#allocation6], %s982_s10, %s982_s10, %s983_s11  }
  0x2d   :  { %s988_s27 = smov [#allocation10]  }
  0x2e   :  { %s74_s28 = sshll.u32 %s988_s27, 4  ;;  %s75_s28 = int_to_ptr.vmem [resolvable:$true] %s74_s28 }
  0x2f   :  { %s940_s29 = scalar_lea.vmem %s75_s28, 2048  ;;  %p945_p7 = scmp.lt.s32.totalorder %s75_s28, %s75_s28 }
  0x30   :  { %p941_p6 = scmp.ne.s32.totalorder %s75_s28, %s940_s29  ;;  %p946_p8 = scmp.lt.s32.totalorder %s940_s29, %s940_s29 }
  0x32   :  { %p947_p9 = por %p946_p8, %p945_p7 }
  0x34   :  { %p948_p10 = pnand %p947_p9, %p941_p6 }
  0x36   :  { %951 = shalt.err (!%p948_p10)
}
  0x37   :  { %80 = dma.hbm_to_vmem [thread:$0]  %s1109_s6, 2048, %s75_s28, [#allocation9], %s982_s10, %s982_s10, %s983_s11  }
  0x38   :  { %972 = dma.done.wait [#allocation3], 256  }
  0x39   :  { %973 = vsyncadd [#allocation3], 4294967040 }
  0x3a   :  { %974 = dma.done.wait [#allocation6], 768  }
  0x3b   :  { %975 = vsyncadd [#allocation6], 4294966528 }
  0x3c   :  { %976 = dma.done.wait [#allocation9], 3072  }
  0x3d   :  { %977 = vsyncadd [#allocation9], 4294964224  ;;  %v989_v0 = vmov 0.0   ;;  %vm113_vm0 = vcmask 261120   ;;  %v105_v1 = vld [vmem:[#allocation7 + $0x18] sm:$0xff]  ;;  %v104_v2 = vld [vmem:[#allocation7 + $0x10] sm:$0xff]  ;;  %v205_v17 = vlaneseq }
  0x3e   :  { %787 = vmatprep.subr.mxu1 %v989_v0  ;;  %766 = vmatprep.subr.mxu0 %v105_v1  ;;  %v98_v3 = vld [vmem:[#allocation2] sm:$0xff]  ;;  %v103_v4 = vld [vmem:[#allocation7 + $0x8] sm:$0xff]  ;;  %v202_v7 = vld [vmem:[#allocation8 + $0x38] sm:$0xff]  ;;  %vm990_vm1 = vmmov 0   ;;  %vm438_vm2 = vcmask 64512   ;;  %s991_s13 = smov [#allocation11]  }
  0x3f   :  { %767 = vmatpush3.msra.mxu0 %v105_v1  ;;  %774 = vmatprep.mubr.msk.f32.mxu0 %vm113_vm0, %v98_v3  ;;  %v102_v5 = vld [vmem:[#allocation7] sm:$0xff]  ;;  %v99_v6 = vld [vmem:[#allocation2 + $0x8] sm:$0xff]  ;;  %v201_v8 = vld [vmem:[#allocation8 + $0x30] sm:$0xff]  ;;  %v206_v18 = vshrl.u32 %v205_v17, 7  ;;  %s712_s14 = sshll.u32 %s991_s13, 4  ;;  %s713_s14 = int_to_ptr.vmem [resolvable:$true] %s712_s14 }
  0x40   :  { %768 = vmatprep.subr.mxu0 %v104_v2  ;;  %v200_v9 = vld [vmem:[#allocation8 + $0x28] sm:$0xff]  ;;  %v199_v10 = vld [vmem:[#allocation8 + $0x20] sm:$0xff]  ;;  %v198_v11 = vld [vmem:[#allocation8 + $0x18] sm:$0xff]  ;;  %789 = vmatprep.mubr.msk.f32.mxu1 %vm990_vm1, %v989_v0  ;;  %s952_s15 = scalar_lea.vmem %s713_s14, 256  ;;  %p957_p12 = scmp.lt.s32.totalorder %s713_s14, %s713_s14 }
  0x41   :  { %769 = vmatpush3.msra.mxu0 %v104_v2  ;;  %v197_v12 = vld [vmem:[#allocation8 + $0x10] sm:$0xff]  ;;  %v196_v13 = vld [vmem:[#allocation8 + $0x8] sm:$0xff]  ;;  %v195_v14 = vld [vmem:[#allocation8] sm:$0xff]  ;;  %v207_v19 = vsub.s32 0, %v206_v18  ;;  %v211_v22 = vsub.s32 1, %v206_v18  ;;  %p953_p11 = scmp.ne.s32.totalorder %s713_s14, %s952_s15  ;;  %p958_p13 = scmp.lt.s32.totalorder %s952_s15, %s952_s15 }
  0x42   :  { %770 = vmatprep.subr.mxu0 %v103_v4  ;;  %v100_v15 = vld [vmem:[#allocation5] sm:$0xff]  ;;  %v101_v16 = vld [vmem:[#allocation5 + $0x8] sm:$0xff]  ;;  %v203_v21 = vld [vmem:[%s1108_s5] sm:$0x3] }
  0x43   :  { %771 = vmatpush3.msra.mxu0 %v103_v4  ;;  %v208_v23 = vrot.slane %v203_v21, %v207_v19  ;;  %v212_v25 = vrot.slane %v203_v21, %v211_v22  ;;  %v726_v27 = vld [vmem:[%s1106_s3] ss:$0 sm:$0xff]  ;;  %v622_v53 = vld [vmem:[#allocation10 + $0x78] sm:$0xff]  ;;  %v621_v54 = vld [vmem:[#allocation10 + $0x70] sm:$0xff]  ;;  %p959_p0 = por %p958_p13, %p957_p12 }
  0x44   :  { %772 = vmatprep.subr.mxu0 %v102_v5  ;;  %v620_v55 = vld [vmem:[#allocation10 + $0x68] sm:$0xff]  ;;  %v619_v56 = vld [vmem:[#allocation10 + $0x60] sm:$0xff]  ;;  %v618_v57 = vld [vmem:[#allocation10 + $0x58] sm:$0xff] }
  0x45   :  { %773 = vmatpush3.msra.mxu0 %v102_v5  ;;  %v617_v58 = vld [vmem:[#allocation10 + $0x50] sm:$0xff]  ;;  %v616_v59 = vld [vmem:[#allocation10 + $0x48] sm:$0xff]  ;;  %v615_v60 = vld [vmem:[#allocation10 + $0x40] sm:$0xff]  ;;  %p960_p1 = pnand %p959_p0, %p953_p11 }
  0x46   :  { %775 = vmatmul.mubr.msk.f32.vlgmr.msra.gmra.mxu0 %vm113_vm0, %v99_v6  ;;  %245 = vmatprep.subr.mxu0 %v202_v7  ;;  %v614_v61 = vld [vmem:[#allocation10 + $0x38] sm:$0xff]  ;;  %v613_v62 = vld [vmem:[#allocation10 + $0x30] sm:$0xff]  ;;  %v612_v63 = vld [vmem:[#allocation10 + $0x28] sm:$0xff] }
  0x47   :  { %246 = vmatpush1.msra.mxu0 %v201_v8  ;;  %285 = vmatprep.mubr.f32.mxu0 %v989_v0  ;;  %v610_v1 = vld [vmem:[#allocation10 + $0x18] sm:$0xff]  ;;  %v609_v2 = vld [vmem:[#allocation10 + $0x10] sm:$0xff]  ;;  %v608_v3 = vld [vmem:[#allocation10 + $0x8] sm:$0xff] }
  0x48   :  { %247 = vmatprep.subr.mxu0 %v200_v9  ;;  %v607_v4 = vld [vmem:[#allocation10] sm:$0xff] }
  0x49   :  { %248 = vmatpush1.msra.mxu0 %v199_v10 }
  0x4a   :  { %249 = vmatprep.subr.mxu0 %v198_v11 }
  0x4b   :  { %250 = vmatpush1.msra.mxu0 %v197_v12 }
  0x4c   :  { %251 = vmatprep.subr.mxu0 %v196_v13 }
  0x4d   :  { %252 = vmatpush1.msra.mxu0 %v195_v14 }
  0x4e   :  { %729 = vmatmul.mubr.msk.f32.vlgmr.msra.gmra.mxu0 %vm113_vm0, %v100_v15  ;;  %777 = vmatprep.subr.mxu0 %v989_v0  ;;  %v733_v15 = vld [vmem:[%s1110_s7] ss:$0 sm:$0xff] }
  0x4f   :  { %291 = vmatprep.mubr.f32.mxu0 %v989_v0 }
  0x52   :  { %730 = vmatmul.mubr.msk.f32.gmra.mxu0 %vm113_vm0, %v101_v16 }
  0x53   :  { %779 = vmatprep.mubr.msk.f32.mxu0 %vm990_vm1, %v989_v0 }
 0x106   :  { %v776_v20 = vpop.f32.mrf.mxu0 }
 0x107   :  { %v192_v35 = vadd.f32 %v776_v20, %v726_v27 }
 0x108   :  { %v186_v24 = vpop.f32.mrf.mxu0 }
 0x109   :  { %v187_v31 = vadd.f32 %v726_v27, %v186_v24 }
 0x10e   :  { %v287_v26 = vpop.f32.mrf.mxu0 }
 0x10f   :  { %v288_v28 = vadd.f32 %v287_v26, %v208_v23 }
 0x110   :  { %v289_v29 = vpop.f32.mrf.mxu0 }
 0x111   :  { %v290_v30 = vadd.f32 %v289_v29, %v212_v25  ;;  %778 = vmatpush3.xpose.msra.mxu0 %v288_v28 }
 0x112   :  { %v293_v32 = vpop.f32.mrf.mxu0  ;;  %782 = vmatprep.subr.mxu0 %v989_v0 }
 0x113   :  { %v294_v33 = vadd.f32 %v293_v32, %v208_v23  ;;  %788 = vmatpush3.msra.mxu1 %v290_v30 }
 0x114   :  { %780 = vmatmul.mubr.f32.vlgmr.msra.gmra.mxu0 %v187_v31  ;;  %v295_v34 = vpop.f32.mrf.mxu0  ;;  %797 = vmatprep.subr.mxu1 %v622_v53 }
 0x115   :  { %783 = vmatpush3.xpose.msra.mxu0 %v294_v33  ;;  %784 = vmatprep.mubr.msk.f32.mxu0 %vm990_vm1, %v989_v0  ;;  %v296_v36 = vadd.f32 %v295_v34, %v212_v25 }
 0x116   :  { %792 = vmatprep.subr.mxu0 %v989_v0 }
 0x118   :  { %785 = vmatmul.mubr.f32.vlgmr.msra.gmra.mxu0 %v192_v35 }
 0x119   :  { %793 = vmatpush3.msra.mxu0 %v296_v36  ;;  %794 = vmatprep.mubr.msk.f32.mxu0 %vm990_vm1, %v989_v0  ;;  %v611_v0 = vld [vmem:[#allocation10 + $0x20] sm:$0xff] }
 0x1d4   :  { %v364_v37 = vpop.f32.mrf.mxu0 }
 0x1d5   :  { %v439_v38 = vsel %vm438_vm2, %v364_v37, -inf }
 0x1d6   :  { %440 = vmax.xlane.f32.xlu0 %v439_v38  ;;  %v781_v39 = vpop.f32.mrf.mxu0 }
 0x1d8   :  { %v434_v40 = vpop.f32.mrf.mxu0 }
 0x1d9   :  { %v442_v41 = vsel %vm438_vm2, %v434_v40, -inf }
 0x1da   :  { %443 = vmax.xlane.f32.xlu0 %v442_v41  ;;  %v786_v42 = vpop.f32.mrf.mxu0 }
 0x25f   :  { %v441_v43 = vpop.xlane.xlu0 %440 }
 0x260   :  { %v445_v44 = vsub.f32 %v364_v37, %v441_v43 }
 0x262   :  { %v447_v45 = vmul.f32 1.442695, %v445_v44 }
 0x263   :  { %v444_v46 = vpop.xlane.xlu0 %443 }
 0x264   :  { %844 = vpow2.f32 %v447_v45  ;;  %v446_v47 = vsub.f32 %v434_v40, %v444_v46 }
 0x266   :  { %v449_v48 = vmul.f32 1.442695, %v446_v47 }
 0x268   :  { %846 = vpow2.f32 %v449_v48 }
 0x271   :  { %v845_v49 = vpop.eup %844 }
 0x272   :  { %790 = vmatmul.mubr.msk.f32.vlgmr.msra.gmra.mxu1 %vm438_vm2, %v845_v49  ;;  %v451_v50 = vsel %vm438_vm2, %v845_v49, 0.0 }
 0x273   :  { %452 = vadd.xlane.f32.xlu1 %v451_v50  ;;  %798 = vmatpush3.msra.mxu1 %v622_v53 }
 0x274   :  { %799 = vmatprep.subr.mxu1 %v621_v54 }
 0x275   :  { %v847_v51 = vpop.eup %846  ;;  %800 = vmatpush3.msra.mxu1 %v621_v54 }
 0x276   :  { %795 = vmatmul.mubr.msk.f32.vlgmr.msra.gmra.mxu0 %vm438_vm2, %v847_v51  ;;  %v454_v52 = vsel %vm438_vm2, %v847_v51, 0.0  ;;  %801 = vmatprep.subr.mxu1 %v620_v55 }
 0x277   :  { %455 = vadd.xlane.f32.xlu1 %v454_v52  ;;  %802 = vmatpush3.msra.mxu1 %v620_v55 }
 0x278   :  { %803 = vmatprep.subr.mxu1 %v619_v56 }
 0x279   :  { %804 = vmatpush3.msra.mxu1 %v619_v56 }
 0x27a   :  { %805 = vmatprep.subr.mxu1 %v618_v57 }
 0x27b   :  { %806 = vmatpush3.msra.mxu1 %v618_v57 }
 0x27c   :  { %807 = vmatprep.subr.mxu1 %v617_v58 }
 0x27d   :  { %808 = vmatpush3.msra.mxu1 %v617_v58 }
 0x27e   :  { %809 = vmatprep.subr.mxu1 %v616_v59 }
 0x27f   :  { %810 = vmatpush3.msra.mxu1 %v616_v59 }
 0x280   :  { %811 = vmatprep.subr.mxu1 %v615_v60 }
 0x281   :  { %812 = vmatpush3.msra.mxu1 %v615_v60 }
 0x282   :  { %813 = vmatprep.subr.mxu1 %v614_v61 }
 0x283   :  { %814 = vmatpush3.msra.mxu1 %v614_v61 }
 0x284   :  { %815 = vmatprep.subr.mxu1 %v613_v62 }
 0x285   :  { %816 = vmatpush3.msra.mxu1 %v613_v62 }
 0x286   :  { %817 = vmatprep.subr.mxu1 %v612_v63 }
 0x287   :  { %818 = vmatpush3.msra.mxu1 %v612_v63 }
 0x288   :  { %819 = vmatprep.subr.mxu1 %v611_v0 }
 0x289   :  { %820 = vmatpush3.msra.mxu1 %v611_v0 }
 0x28a   :  { %821 = vmatprep.subr.mxu1 %v610_v1 }
 0x28b   :  { %822 = vmatpush3.msra.mxu1 %v610_v1 }
 0x28c   :  { %823 = vmatprep.subr.mxu1 %v609_v2 }
 0x28d   :  { %824 = vmatpush3.msra.mxu1 %v609_v2 }
 0x28e   :  { %825 = vmatprep.subr.mxu1 %v608_v3 }
 0x28f   :  { %826 = vmatpush3.msra.mxu1 %v608_v3 }
 0x290   :  { %827 = vmatprep.subr.mxu1 %v607_v4 }
 0x291   :  { %828 = vmatpush3.msra.mxu1 %v607_v4 }
 0x2fc   :  { %v453_v5 = vpop.xlane.xlu1 %452 }
 0x2fd   :  { %848 = vrcp.f32 %v453_v5 }
 0x300   :  { %v456_v6 = vpop.xlane.xlu1 %455 }
 0x301   :  { %850 = vrcp.f32 %v456_v6 }
 0x30a   :  { %v849_v7 = vpop.eup %848 }
 0x30e   :  { %v851_v11 = vpop.eup %850 }
 0x332   :  { %v528_v8 = vpop.f32.mrf.mxu1 }
 0x333   :  { %v605_v9 = vmul.f32 %v849_v7, %v528_v8 }
 0x334   :  { %v791_v10 = vpop.f32.mrf.mxu1 }
 0x335   :  { %829 = vmatprep.mubr.f32.mxu1 %v605_v9 }
 0x336   :  { %v601_v12 = vpop.f32.mrf.mxu0 }
 0x337   :  { %v606_v13 = vmul.f32 %v851_v11, %v601_v12 }
 0x338   :  { %v796_v14 = vpop.f32.mrf.mxu0 }
 0x339   :  { %830 = vmatmul.mubr.f32.vlgmr.msra.gmra.mxu1 %v606_v13 }
 0x3f9   :  { %v831_v16 = vpop.f32.mrf.mxu1 }
 0x3fa   :  { %v702_v17 = vadd.f32 %v831_v16, %v733_v15 }
 0x3fb   :  { %v696_v18 = vpop.f32.mrf.mxu1 }
 0x3fc   :  { %706 = vst [vmem:[#allocation11 + $0x8] sm:$0xff] %v702_v17  ;;  %v697_v19 = vadd.f32 %v733_v15, %v696_v18 }
 0x3fe   :  { %705 = vst [vmem:[#allocation11] sm:$0xff] %v697_v19 }
 0x3ff   :  { %963 = shalt.err (!%p960_p1)
}
 0x400   :  { %718 = dma.vmem_to_hbm [thread:$0]  %s713_s14, 256, %s1111_s8, [#allocation4], %s982_s10, %s982_s10, %s983_s11  }
 0x401   :  { %978 = dma.done.wait [#allocation4], 256  }
 0x402   :  { %979 = vsyncadd [#allocation4], 4294967040 }
 0x403   :  { %722 = vsyncpa [#allocation3], 1 }
 0x404   :  { %723 = vsyncpa [#allocation6], 1 }
 0x405   :  { %724 = vsyncpa [#allocation9], 1 }
 0x406   :  { %725 = vsyncpa [#allocation4], 1 }

</bundles_post_ra>
